<compile_context>
chip_gen: v6e
topology: v6e:2x2x1
jax: 0.10.0
libtpu: 0.0.40
codegen_flags: <defaults>
</compile_context>

<pallas_src>
import math
from functools import partial

import jax
import jax.numpy as jnp
from jax import lax
from jax.experimental import pallas as pl
from jax.experimental.pallas import tpu as pltpu


# ------------------------- generation-aware tuning ---------------------------

def _tpu_vmem_capacity_bytes():
    cap = None
    try:
        info = pltpu.get_tpu_info()
        cap = getattr(info, "vmem_capacity_bytes", None)
    except Exception:
        cap = None
    if cap is None:
        try:
            kind = jax.devices()[0].device_kind.lower()
        except Exception:
            kind = ""
        cap = 64 * 1024 * 1024 if "v7" in kind else 128 * 1024 * 1024
    return int(cap)


def _vmem_limit_and_ff_cap():
    """Return (vmem_limit_bytes, max FF tile) for the current TPU generation."""
    cap = _tpu_vmem_capacity_bytes()
    if cap <= 64 * 1024 * 1024:
        # v7x: 64 MiB physical per TensorCore -> leave headroom, smaller FF tiles.
        return min(48 * 1024 * 1024, (cap * 3) // 4), 1024
    # v5e / v6e: 128 MiB physical -> use most of it, keep large FF tiles.
    return min(108 * 1024 * 1024, (cap * 85) // 100), 2048


def _pick_ff_tile(ff, max_tile):
    """Largest FF tile <= max_tile that is a multiple of 128 and divides FF."""
    if ff <= max_tile or ff % 128 != 0:
        return ff
    for t in range(max_tile, 127, -128):
        if ff % t == 0:
            return t
    return ff


# --------------------------------- kernel ------------------------------------

def _encoder_layer_kernel(x_ref, wqkv_ref, bqkv_ref, wo_ref, bo_ref,
                          w1_ref, b1_ref, w2_ref, b2_ref,
                          g1_ref, be1_ref, g2_ref, be2_ref,
                          o_ref,
                          qkv_ref, attn_ref, h1n_ref, h1nb_ref, acc_ref,
                          *, nhead, eps):
    ffk = pl.program_id(1)
    nffk = pl.num_programs(1)

    # ---- self-attention + residual + LayerNorm1 (first FF-tile step only) ----
    @pl.when(ffk == 0)
    def _attn_ln1():
        x = x_ref[0]                                    # (S, D) f32
        D = x.shape[-1]
        hd = D // nhead
        xb = x.astype(jnp.bfloat16)

        # Fused QKV projection: one (S, D) @ (D, 3D) MXU op. The softmax scale
        # is pre-folded into the Q columns/bias; the K bias is dropped (no mask
        # -> it only adds a per-query constant that softmax removes).
        qkv = jnp.dot(xb, wqkv_ref[...],
                      preferred_element_type=jnp.float32) + bqkv_ref[...]
        qkv_ref[...] = qkv.astype(jnp.bfloat16)

        # TODO(synk): src_mask / src_key_padding_mask not supported (None path only).
        # TODO(synk): flash-style query tiling (for very long S on v7x) not implemented.
        for h in range(nhead):                           # unrolled at trace time
            q_h = qkv_ref[:, h * hd:(h + 1) * hd]                    # bf16, pre-scaled
            k_h = qkv_ref[:, D + h * hd:D + (h + 1) * hd]
            v_h = qkv_ref[:, 2 * D + h * hd:2 * D + (h + 1) * hd]
            s = lax.dot_general(q_h, k_h, (((1,), (1,)), ((), ())),
                                preferred_element_type=jnp.float32)  # (S, S)
            s = s - jnp.max(s, axis=-1, keepdims=True)
            p = jnp.exp(s)
            l = jnp.sum(p, axis=-1, keepdims=True)
            o_h = jnp.dot(p.astype(jnp.bfloat16), v_h,
                          preferred_element_type=jnp.float32)        # (S, hd)
            # deferred softmax normalization; write straight into the bf16
            # head-concat scratch (bounds liveness to one head, no concat).
            attn_ref[:, h * hd:(h + 1) * hd] = (
                o_h * pl.reciprocal(l, approx=False)).astype(jnp.bfloat16)

        # single (S, D) @ (D, D) out-projection from the lane-dense scratch
        attn = jnp.dot(attn_ref[...], wo_ref[...],
                       preferred_element_type=jnp.float32) + bo_ref[...]

        h1 = x + attn                                    # dropout1 == identity (eval)
        mu1 = jnp.mean(h1, axis=-1, keepdims=True)
        var1 = jnp.mean(jnp.square(h1 - mu1), axis=-1, keepdims=True)
        h1n = (h1 - mu1) * lax.rsqrt(var1 + eps) * g1_ref[...] + be1_ref[...]
        h1n_ref[...] = h1n                               # f32 copy (residual / LN2)
        h1nb_ref[...] = h1n.astype(jnp.bfloat16)         # bf16 copy (FFN matmuls)
        acc_ref[...] = jnp.zeros_like(acc_ref)

    # ---- FFN: stream one (D, tFF) / (tFF, D) weight tile per grid step ----
    f = jnp.dot(h1nb_ref[...], w1_ref[...],
                preferred_element_type=jnp.float32) + b1_ref[...]
    f = jnp.maximum(f, 0.0).astype(jnp.bfloat16)
    acc_ref[...] = acc_ref[...] + jnp.dot(f, w2_ref[...],
                                          preferred_element_type=jnp.float32)

    # ---- residual + LayerNorm2 (last FF-tile step only) ----
    @pl.when(ffk == nffk - 1)
    def _ln2():
        h2 = h1n_ref[...] + acc_ref[...] + b2_ref[...]
        mu2 = jnp.mean(h2, axis=-1, keepdims=True)
        var2 = jnp.mean(jnp.square(h2 - mu2), axis=-1, keepdims=True)
        o_ref[0] = ((h2 - mu2) * lax.rsqrt(var2 + eps) * g2_ref[...]
                    + be2_ref[...]).astype(o_ref.dtype)


# ----------------------- weight preparation (once, at load) ------------------

def prepare_layer_params(p, *, nhead):
    """Transpose / bf16-cast / fuse the PyTorch-style params for the kernel.
    Call this ONCE at model-load time; per-forward re-preparation wastes HBM BW."""
    D = p["out_proj_weight"].shape[0]
    assert D % nhead == 0
    hd = D // nhead
    scale = 1.0 / math.sqrt(hd)
    bf16, f32 = jnp.bfloat16, jnp.float32

    w_in_t = jnp.asarray(p["in_proj_weight"]).astype(f32).T          # (D, 3D)
    col_scale = jnp.concatenate([jnp.full((D,), scale, f32),
                                 jnp.ones((2 * D,), f32)])
    w_qkv = (w_in_t * col_scale[None, :]).astype(bf16)               # scale folded into Q
    b_in = jnp.asarray(p["in_proj_bias"]).astype(f32)
    b_qkv = jnp.concatenate([b_in[:D] * scale,                       # scaled Q bias
                             jnp.zeros((D,), f32),                   # K bias dropped
                             b_in[2 * D:]])[None, :]

    return {
        "w_qkv": w_qkv,                                              # (D, 3D) bf16
        "b_qkv": b_qkv,                                              # (1, 3D) f32
        "wo": jnp.asarray(p["out_proj_weight"]).astype(f32).T.astype(bf16),
        "bo": jnp.asarray(p["out_proj_bias"]).astype(f32)[None, :],
        "w1": jnp.asarray(p["w1"]).astype(f32).T.astype(bf16),       # (D, FF) bf16
        "b1": jnp.asarray(p["b1"]).astype(f32)[None, :],
        "w2": jnp.asarray(p["w2"]).astype(f32).T.astype(bf16),       # (FF, D) bf16
        "b2": jnp.asarray(p["b2"]).astype(f32)[None, :],
        "g1": jnp.asarray(p["ln1_weight"]).astype(f32)[None, :],
        "be1": jnp.asarray(p["ln1_bias"]).astype(f32)[None, :],
        "g2": jnp.asarray(p["ln2_weight"]).astype(f32)[None, :],
        "be2": jnp.asarray(p["ln2_bias"]).astype(f32)[None, :],
    }


def prepare_encoder_params(layers_params, *, nhead):
    return [prepare_layer_params(p, nhead=nhead) for p in layers_params]


# ------------------------------ layer wrapper --------------------------------

def _encoder_layer(x_bsd, pp, *, nhead, eps, ff_tile=None):
    """One encoder layer on a (B, S, D) activation slab. `pp` is a prepared dict."""
    B, S, D = x_bsd.shape
    FF = pp["w1"].shape[1]
    vmem_limit, ff_cap = _vmem_limit_and_ff_cap()
    tFF = _pick_ff_tile(FF, ff_cap) if ff_tile is None else ff_tile
    assert FF % tFF == 0
    nffk = FF // tFF

    def inv(shape):          # grid-invariant operand: single-buffered block 0
        return pl.BlockSpec(shape, lambda b, k: (0,) * len(shape),
                            pipeline_mode=pl.Buffered(1))

    kernel = partial(_encoder_layer_kernel, nhead=nhead, eps=eps)
    return pl.pallas_call(
        kernel,
        out_shape=jax.ShapeDtypeStruct((B, S, D), x_bsd.dtype),
        grid_spec=pltpu.PrefetchScalarGridSpec(
            num_scalar_prefetch=0,
            grid=(B, nffk),                 # batch parallel, FF tiles last (reduction)
            in_specs=[
                pl.BlockSpec((1, S, D), lambda b, k: (b, 0, 0)),     # x slab per batch
                inv((D, 3 * D)), inv((1, 3 * D)),                    # fused QKV W^T, bias
                inv((D, D)), inv((1, D)),                            # Wo^T, bo
                pl.BlockSpec((D, tFF), lambda b, k: (0, k)),         # W1^T tile
                pl.BlockSpec((1, tFF), lambda b, k: (0, k)),         # b1 tile
                pl.BlockSpec((tFF, D), lambda b, k: (k, 0)),         # W2^T tile
                inv((1, D)),                                         # b2
                inv((1, D)), inv((1, D)), inv((1, D)), inv((1, D)),  # ln1 / ln2
            ],
            out_specs=pl.BlockSpec((1, S, D), lambda b, k: (b, 0, 0)),
            scratch_shapes=[pltpu.VMEM((S, 3 * D), jnp.bfloat16),    # fused QKV (bf16)
                            pltpu.VMEM((S, D), jnp.bfloat16),        # head-concat attn out
                            pltpu.VMEM((S, D), jnp.float32),         # h1n (post-LN1, f32)
                            pltpu.VMEM((S, D), jnp.bfloat16),        # h1n (bf16, FFN input)
                            pltpu.VMEM((S, D), jnp.float32)],        # FFN accumulator
        ),
        compiler_params=pltpu.CompilerParams(
            dimension_semantics=("parallel", "arbitrary"),
            vmem_limit_bytes=vmem_limit),
    )(x_bsd, pp["w_qkv"], pp["b_qkv"], pp["wo"], pp["bo"],
      pp["w1"], pp["b1"], pp["w2"], pp["b2"],
      pp["g1"], pp["be1"], pp["g2"], pp["be2"])


def transformer_encoder(src, layers_params, *, nhead, eps=1e-5, norm=None, ff_tile=None):
    """src: (S, B, D) -> (S, B, D).
    `layers_params`: list of per-layer dicts, either prepared (see
    prepare_encoder_params) or raw PyTorch-style (prepared on the fly).
    `norm`: optional (weight, bias) for a final LayerNorm (default None)."""
    # Transpose once for the whole stack, run the layers in (B, S, D),
    # transpose back once at the end.
    x = jnp.transpose(src, (1, 0, 2))
    for p in layers_params:
        if "w_qkv" not in p:                      # raw params -> prepare on the fly
            p = prepare_layer_params(p, nhead=nhead)
        x = _encoder_layer(x, p, nhead=nhead, eps=eps, ff_tile=ff_tile)
    out = jnp.transpose(x, (1, 0, 2))
    if norm is not None:
        g, b = norm
        mu = out.mean(-1, keepdims=True)
        var = ((out - mu) ** 2).mean(-1, keepdims=True)
        out = (out - mu) / jnp.sqrt(var + eps) * g + b
    return out
    # TODO(synk): TransformerEncoder.infer (incremental KV-cache path) not implemented.


# ----------------------------- pure-JAX reference -----------------------------

def _reference_layer(x, params, *, nhead, eps):
    S, B, D = x.shape
    hd = D // nhead
    qkv = jnp.einsum('sbd,ed->sbe', x, params["in_proj_weight"]) + params["in_proj_bias"]
    q, k, v = jnp.split(qkv, 3, axis=-1)

    def heads(t):
        return t.reshape(S, B, nhead, hd).transpose(1, 2, 0, 3)     # (B, H, S, hd)

    qh, kh, vh = heads(q), heads(k), heads(v)
    s = jnp.einsum('bhqd,bhkd->bhqk', qh, kh) / math.sqrt(hd)
    p = jax.nn.softmax(s, axis=-1)
    o = jnp.einsum('bhqk,bhkd->bhqd', p, vh)
    o = o.transpose(2, 0, 1, 3).reshape(S, B, D)
    attn = jnp.einsum('sbd,ed->sbe', o, params["out_proj_weight"]) + params["out_proj_bias"]

    def ln(t, g, b_):
        mu = t.mean(-1, keepdims=True)
        var = ((t - mu) ** 2).mean(-1, keepdims=True)
        return (t - mu) / jnp.sqrt(var + eps) * g + b_

    h1 = ln(x + attn, params["ln1_weight"], params["ln1_bias"])
    f = jnp.maximum(jnp.einsum('sbd,fd->sbf', h1, params["w1"]) + params["b1"], 0.0)
    f = jnp.einsum('sbf,df->sbd', f, params["w2"]) + params["b2"]
    return ln(h1 + f, params["ln2_weight"], params["ln2_bias"])


def reference_encoder(src, layers_params, *, nhead, eps=1e-5):
    x = src
    for p in layers_params:
        x = _reference_layer(x, p, nhead=nhead, eps=eps)
    return x


def make_params(key, d_model, nhead, dim_feedforward):
    ks = jax.random.split(key, 8)
    scale = 0.05
    return {
        "in_proj_weight": scale * jax.random.normal(ks[0], (3 * d_model, d_model), jnp.float32),
        "in_proj_bias": scale * jax.random.normal(ks[1], (3 * d_model,), jnp.float32),
        "out_proj_weight": scale * jax.random.normal(ks[2], (d_model, d_model), jnp.float32),
        "out_proj_bias": scale * jax.random.normal(ks[3], (d_model,), jnp.float32),
        "w1": scale * jax.random.normal(ks[4], (dim_feedforward, d_model), jnp.float32),
        "b1": scale * jax.random.normal(ks[5], (dim_feedforward,), jnp.float32),
        "w2": scale * jax.random.normal(ks[6], (d_model, dim_feedforward), jnp.float32),
        "b2": scale * jax.random.normal(ks[7], (dim_feedforward // dim_feedforward * d_model,), jnp.float32)[:d_model],
        "ln1_weight": jnp.ones((d_model,), jnp.float32),
        "ln1_bias": jnp.zeros((d_model,), jnp.float32),
        "ln2_weight": jnp.ones((d_model,), jnp.float32),
        "ln2_bias": jnp.zeros((d_model,), jnp.float32),
    }


if __name__ == "__main__":
    S, B, D, H, FF, L = 8, 2, 32, 4, 64, 2          # (seq, batch, d_model, heads, ffn, layers)
    key = jax.random.PRNGKey(0)
    k_x, k_p = jax.random.split(key)
    src = jax.random.normal(k_x, (S, B, D), jnp.float32)    # (seq, batch, d_model)
    layers_params = [make_params(k, D, H, FF) for k in jax.random.split(k_p, L)]

    # weight preprocessing hoisted out of the forward path (done once here)
    prepared = prepare_encoder_params(layers_params, nhead=H)

    out = transformer_encoder(src, prepared, nhead=H)
    out = jax.block_until_ready(out)

    ref = reference_encoder(src, layers_params, nhead=H)
    assert out.shape == (S, B, D)
    # bf16 matmuls -> loosened tolerance vs. f32 reference
    assert jnp.allclose(out, ref, atol=5e-2, rtol=5e-2), float(jnp.max(jnp.abs(out - ref)))
    print("KERNEL_OK")
</pallas_src>

<mosaic_0001>
module attributes {stable_mosaic.version = 11 : i64} {
  func.func @_encoder_layer_kernel(%arg0: i32, %arg1: i32, %arg2: memref<1x8x32xf32, #tpu.memory_space<vmem>>, %arg3: memref<32x96xbf16, #tpu.memory_space<vmem>>, %arg4: memref<1x96xf32, #tpu.memory_space<vmem>>, %arg5: memref<32x32xbf16, #tpu.memory_space<vmem>>, %arg6: memref<1x32xf32, #tpu.memory_space<vmem>>, %arg7: memref<32x64xbf16, #tpu.memory_space<vmem>>, %arg8: memref<1x64xf32, #tpu.memory_space<vmem>>, %arg9: memref<64x32xbf16, #tpu.memory_space<vmem>>, %arg10: memref<1x32xf32, #tpu.memory_space<vmem>>, %arg11: memref<1x32xf32, #tpu.memory_space<vmem>>, %arg12: memref<1x32xf32, #tpu.memory_space<vmem>>, %arg13: memref<1x32xf32, #tpu.memory_space<vmem>>, %arg14: memref<1x32xf32, #tpu.memory_space<vmem>>, %arg15: memref<1x8x32xf32, #tpu.memory_space<vmem>>, %arg16: memref<8x96xbf16, #tpu.memory_space<vmem>>, %arg17: memref<8x32xbf16, #tpu.memory_space<vmem>>, %arg18: memref<8x32xf32, #tpu.memory_space<vmem>>, %arg19: memref<8x32xbf16, #tpu.memory_space<vmem>>, %arg20: memref<8x32xf32, #tpu.memory_space<vmem>>) attributes {dimension_semantics = [#tpu.dimension_semantics<parallel>, #tpu.dimension_semantics<arbitrary>], iteration_bounds = array<i64: 2, 1>, scalar_prefetch = 0 : i64, scratch_operands = 5 : i64, tpu.core_type = #tpu.core_type<tc>, window_params = [{transform_indices = @transform_0, window_bounds = array<i64: 1, 8, 32>}, {pipeline_mode = #tpu.pipeline_mode<synchronous>, transform_indices = @transform_1, window_bounds = array<i64: 32, 96>}, {pipeline_mode = #tpu.pipeline_mode<synchronous>, transform_indices = @transform_2, window_bounds = array<i64: 1, 96>}, {pipeline_mode = #tpu.pipeline_mode<synchronous>, transform_indices = @transform_3, window_bounds = array<i64: 32, 32>}, {pipeline_mode = #tpu.pipeline_mode<synchronous>, transform_indices = @transform_4, window_bounds = array<i64: 1, 32>}, {transform_indices = @transform_5, window_bounds = array<i64: 32, 64>}, {transform_indices = @transform_6, window_bounds = array<i64: 1, 64>}, {transform_indices = @transform_7, window_bounds = array<i64: 64, 32>}, {pipeline_mode = #tpu.pipeline_mode<synchronous>, transform_indices = @transform_8, window_bounds = array<i64: 1, 32>}, {pipeline_mode = #tpu.pipeline_mode<synchronous>, transform_indices = @transform_9, window_bounds = array<i64: 1, 32>}, {pipeline_mode = #tpu.pipeline_mode<synchronous>, transform_indices = @transform_10, window_bounds = array<i64: 1, 32>}, {pipeline_mode = #tpu.pipeline_mode<synchronous>, transform_indices = @transform_11, window_bounds = array<i64: 1, 32>}, {pipeline_mode = #tpu.pipeline_mode<synchronous>, transform_indices = @transform_12, window_bounds = array<i64: 1, 32>}, {transform_indices = @transform_13, window_bounds = array<i64: 1, 8, 32>}]} {
    %c0_i32 = arith.constant 0 : i32
    %0 = arith.cmpi eq, %arg1, %c0_i32 : i32
    %1 = arith.extui %0 : i1 to i32
    %c0_i32_0 = arith.constant 0 : i32
    %2 = arith.cmpi ne, %1, %c0_i32_0 : i32
    scf.if %2 {
      %c0_16 = arith.constant 0 : index
      %c0_17 = arith.constant 0 : index
      %c0_18 = arith.constant 0 : index
      %20 = vector.load %arg2[%c0_16, %c0_17, %c0_18] : memref<1x8x32xf32, #tpu.memory_space<vmem>>, vector<1x8x32xf32>
      %21 = vector.shape_cast %20 : vector<1x8x32xf32> to vector<8x32xf32>
      %22 = arith.truncf %21 : vector<8x32xf32> to vector<8x32xbf16>
      %c0_19 = arith.constant 0 : index
      %c0_20 = arith.constant 0 : index
      %23 = vector.load %arg3[%c0_19, %c0_20] : memref<32x96xbf16, #tpu.memory_space<vmem>>, vector<32x96xbf16>
      %cst_21 = arith.constant dense<0.000000e+00> : vector<8x96xf32>
      %24 = tpu.matmul %22, %23, %cst_21 {dimension_numbers = #tpu.dot_dimension_numbers<[1], [0], [0], [1], [0, 0, 1, 1], [], []>} : vector<8x32xbf16>, vector<32x96xbf16>, vector<8x96xf32> -> vector<8x96xf32>
      %c0_22 = arith.constant 0 : index
      %c0_23 = arith.constant 0 : index
      %25 = vector.load %arg4[%c0_22, %c0_23] : memref<1x96xf32, #tpu.memory_space<vmem>>, vector<1x96xf32>
      %26 = vector.broadcast %25 : vector<1x96xf32> to vector<8x96xf32>
      %27 = arith.addf %24, %26 : vector<8x96xf32>
      %28 = arith.truncf %27 : vector<8x96xf32> to vector<8x96xbf16>
      %c0_24 = arith.constant 0 : index
      %c0_25 = arith.constant 0 : index
      %29 = vector.load %arg16[%c0_24, %c0_25] : memref<8x96xbf16, #tpu.memory_space<vmem>>, vector<8x96xbf16>
      tpu.vector_store %arg16[%c0_24, %c0_25], %28 {strides = array<i32>} : memref<8x96xbf16, #tpu.memory_space<vmem>>, vector<8x96xbf16>,
      %c0_26 = arith.constant 0 : index
      %c0_27 = arith.constant 0 : index
      %30 = vector.load %arg16[%c0_26, %c0_27] : memref<8x96xbf16, #tpu.memory_space<vmem>>, vector<8x8xbf16>
      %c0_28 = arith.constant 0 : index
      %c32 = arith.constant 32 : index
      %31 = vector.load %arg16[%c0_28, %c32] : memref<8x96xbf16, #tpu.memory_space<vmem>>, vector<8x8xbf16>
      %c0_29 = arith.constant 0 : index
      %c64 = arith.constant 64 : index
      %32 = vector.load %arg16[%c0_29, %c64] : memref<8x96xbf16, #tpu.memory_space<vmem>>, vector<8x8xbf16>
      %cst_30 = arith.constant dense<0.000000e+00> : vector<8x8xf32>
      %33 = tpu.matmul %30, %31, %cst_30 {dimension_numbers = #tpu.dot_dimension_numbers<[1], [1], [0], [0], [0, 0, 1, 0], [], []>} : vector<8x8xbf16>, vector<8x8xbf16>, vector<8x8xf32> -> vector<8x8xf32>
      %cst_31 = arith.constant dense<0xFF800000> : vector<8xf32>
      %34 = vector.multi_reduction <maximumf>, %33, %cst_31 [1] : vector<8x8xf32> to vector<8xf32>
      %35 = vector.shape_cast %34 : vector<8xf32> to vector<8x1xf32>
      %36 = vector.broadcast %35 : vector<8x1xf32> to vector<8x8xf32>
      %37 = arith.subf %33, %36 : vector<8x8xf32>
      %38 = math.exp %37 : vector<8x8xf32>
      %cst_32 = arith.constant dense<0.000000e+00> : vector<8xf32>
      %39 = vector.multi_reduction <add>, %38, %cst_32 [1] : vector<8x8xf32> to vector<8xf32>
      %40 = vector.shape_cast %39 : vector<8xf32> to vector<8x1xf32>
      %41 = arith.truncf %38 : vector<8x8xf32> to vector<8x8xbf16>
      %cst_33 = arith.constant dense<0.000000e+00> : vector<8x8xf32>
      %42 = tpu.matmul %41, %32, %cst_33 {dimension_numbers = #tpu.dot_dimension_numbers<[1], [0], [0], [1], [0, 0, 1, 1], [], []>} : vector<8x8xbf16>, vector<8x8xbf16>, vector<8x8xf32> -> vector<8x8xf32>
      %43 = tpu.reciprocal %40 : vector<8x1xf32> -> vector<8x1xf32>
      %44 = vector.broadcast %43 : vector<8x1xf32> to vector<8x8xf32>
      %45 = arith.mulf %42, %44 : vector<8x8xf32>
      %46 = arith.truncf %45 : vector<8x8xf32> to vector<8x8xbf16>
      %c0_34 = arith.constant 0 : index
      %c0_35 = arith.constant 0 : index
      %47 = vector.load %arg17[%c0_34, %c0_35] : memref<8x32xbf16, #tpu.memory_space<vmem>>, vector<8x8xbf16>
      tpu.vector_store %arg17[%c0_34, %c0_35], %46 {strides = array<i32>} : memref<8x32xbf16, #tpu.memory_space<vmem>>, vector<8x8xbf16>,
      %c0_36 = arith.constant 0 : index
      %c8 = arith.constant 8 : index
      %48 = vector.load %arg16[%c0_36, %c8] : memref<8x96xbf16, #tpu.memory_space<vmem>>, vector<8x8xbf16>
      %c0_37 = arith.constant 0 : index
      %c40 = arith.constant 40 : index
      %49 = vector.load %arg16[%c0_37, %c40] : memref<8x96xbf16, #tpu.memory_space<vmem>>, vector<8x8xbf16>
      %c0_38 = arith.constant 0 : index
      %c72 = arith.constant 72 : index
      %50 = vector.load %arg16[%c0_38, %c72] : memref<8x96xbf16, #tpu.memory_space<vmem>>, vector<8x8xbf16>
      %cst_39 = arith.constant dense<0.000000e+00> : vector<8x8xf32>
      %51 = tpu.matmul %48, %49, %cst_39 {dimension_numbers = #tpu.dot_dimension_numbers<[1], [1], [0], [0], [0, 0, 1, 0], [], []>} : vector<8x8xbf16>, vector<8x8xbf16>, vector<8x8xf32> -> vector<8x8xf32>
      %cst_40 = arith.constant dense<0xFF800000> : vector<8xf32>
      %52 = vector.multi_reduction <maximumf>, %51, %cst_40 [1] : vector<8x8xf32> to vector<8xf32>
      %53 = vector.shape_cast %52 : vector<8xf32> to vector<8x1xf32>
      %54 = vector.broadcast %53 : vector<8x1xf32> to vector<8x8xf32>
      %55 = arith.subf %51, %54 : vector<8x8xf32>
      %56 = math.exp %55 : vector<8x8xf32>
      %cst_41 = arith.constant dense<0.000000e+00> : vector<8xf32>
      %57 = vector.multi_reduction <add>, %56, %cst_41 [1] : vector<8x8xf32> to vector<8xf32>
      %58 = vector.shape_cast %57 : vector<8xf32> to vector<8x1xf32>
      %59 = arith.truncf %56 : vector<8x8xf32> to vector<8x8xbf16>
      %cst_42 = arith.constant dense<0.000000e+00> : vector<8x8xf32>
      %60 = tpu.matmul %59, %50, %cst_42 {dimension_numbers = #tpu.dot_dimension_numbers<[1], [0], [0], [1], [0, 0, 1, 1], [], []>} : vector<8x8xbf16>, vector<8x8xbf16>, vector<8x8xf32> -> vector<8x8xf32>
      %61 = tpu.reciprocal %58 : vector<8x1xf32> -> vector<8x1xf32>
      %62 = vector.broadcast %61 : vector<8x1xf32> to vector<8x8xf32>
      %63 = arith.mulf %60, %62 : vector<8x8xf32>
      %64 = arith.truncf %63 : vector<8x8xf32> to vector<8x8xbf16>
      %c0_43 = arith.constant 0 : index
      %c8_44 = arith.constant 8 : index
      %65 = vector.load %arg17[%c0_43, %c8_44] : memref<8x32xbf16, #tpu.memory_space<vmem>>, vector<8x8xbf16>
      tpu.vector_store %arg17[%c0_43, %c8_44], %64 {strides = array<i32>} : memref<8x32xbf16, #tpu.memory_space<vmem>>, vector<8x8xbf16>,
      %c0_45 = arith.constant 0 : index
      %c16 = arith.constant 16 : index
      %66 = vector.load %arg16[%c0_45, %c16] : memref<8x96xbf16, #tpu.memory_space<vmem>>, vector<8x8xbf16>
      %c0_46 = arith.constant 0 : index
      %c48 = arith.constant 48 : index
      %67 = vector.load %arg16[%c0_46, %c48] : memref<8x96xbf16, #tpu.memory_space<vmem>>, vector<8x8xbf16>
      %c0_47 = arith.constant 0 : index
      %c80 = arith.constant 80 : index
      %68 = vector.load %arg16[%c0_47, %c80] : memref<8x96xbf16, #tpu.memory_space<vmem>>, vector<8x8xbf16>
      %cst_48 = arith.constant dense<0.000000e+00> : vector<8x8xf32>
      %69 = tpu.matmul %66, %67, %cst_48 {dimension_numbers = #tpu.dot_dimension_numbers<[1], [1], [0], [0], [0, 0, 1, 0], [], []>} : vector<8x8xbf16>, vector<8x8xbf16>, vector<8x8xf32> -> vector<8x8xf32>
      %cst_49 = arith.constant dense<0xFF800000> : vector<8xf32>
      %70 = vector.multi_reduction <maximumf>, %69, %cst_49 [1] : vector<8x8xf32> to vector<8xf32>
      %71 = vector.shape_cast %70 : vector<8xf32> to vector<8x1xf32>
      %72 = vector.broadcast %71 : vector<8x1xf32> to vector<8x8xf32>
      %73 = arith.subf %69, %72 : vector<8x8xf32>
      %74 = math.exp %73 : vector<8x8xf32>
      %cst_50 = arith.constant dense<0.000000e+00> : vector<8xf32>
      %75 = vector.multi_reduction <add>, %74, %cst_50 [1] : vector<8x8xf32> to vector<8xf32>
      %76 = vector.shape_cast %75 : vector<8xf32> to vector<8x1xf32>
      %77 = arith.truncf %74 : vector<8x8xf32> to vector<8x8xbf16>
      %cst_51 = arith.constant dense<0.000000e+00> : vector<8x8xf32>
      %78 = tpu.matmul %77, %68, %cst_51 {dimension_numbers = #tpu.dot_dimension_numbers<[1], [0], [0], [1], [0, 0, 1, 1], [], []>} : vector<8x8xbf16>, vector<8x8xbf16>, vector<8x8xf32> -> vector<8x8xf32>
      %79 = tpu.reciprocal %76 : vector<8x1xf32> -> vector<8x1xf32>
      %80 = vector.broadcast %79 : vector<8x1xf32> to vector<8x8xf32>
      %81 = arith.mulf %78, %80 : vector<8x8xf32>
      %82 = arith.truncf %81 : vector<8x8xf32> to vector<8x8xbf16>
      %c0_52 = arith.constant 0 : index
      %c16_53 = arith.constant 16 : index
      %83 = vector.load %arg17[%c0_52, %c16_53] : memref<8x32xbf16, #tpu.memory_space<vmem>>, vector<8x8xbf16>
      tpu.vector_store %arg17[%c0_52, %c16_53], %82 {strides = array<i32>} : memref<8x32xbf16, #tpu.memory_space<vmem>>, vector<8x8xbf16>,
      %c0_54 = arith.constant 0 : index
      %c24 = arith.constant 24 : index
      %84 = vector.load %arg16[%c0_54, %c24] : memref<8x96xbf16, #tpu.memory_space<vmem>>, vector<8x8xbf16>
      %c0_55 = arith.constant 0 : index
      %c56 = arith.constant 56 : index
      %85 = vector.load %arg16[%c0_55, %c56] : memref<8x96xbf16, #tpu.memory_space<vmem>>, vector<8x8xbf16>
      %c0_56 = arith.constant 0 : index
      %c88 = arith.constant 88 : index
      %86 = vector.load %arg16[%c0_56, %c88] : memref<8x96xbf16, #tpu.memory_space<vmem>>, vector<8x8xbf16>
      %cst_57 = arith.constant dense<0.000000e+00> : vector<8x8xf32>
      %87 = tpu.matmul %84, %85, %cst_57 {dimension_numbers = #tpu.dot_dimension_numbers<[1], [1], [0], [0], [0, 0, 1, 0], [], []>} : vector<8x8xbf16>, vector<8x8xbf16>, vector<8x8xf32> -> vector<8x8xf32>
      %cst_58 = arith.constant dense<0xFF800000> : vector<8xf32>
      %88 = vector.multi_reduction <maximumf>, %87, %cst_58 [1] : vector<8x8xf32> to vector<8xf32>
      %89 = vector.shape_cast %88 : vector<8xf32> to vector<8x1xf32>
      %90 = vector.broadcast %89 : vector<8x1xf32> to vector<8x8xf32>
      %91 = arith.subf %87, %90 : vector<8x8xf32>
      %92 = math.exp %91 : vector<8x8xf32>
      %cst_59 = arith.constant dense<0.000000e+00> : vector<8xf32>
      %93 = vector.multi_reduction <add>, %92, %cst_59 [1] : vector<8x8xf32> to vector<8xf32>
      %94 = vector.shape_cast %93 : vector<8xf32> to vector<8x1xf32>
      %95 = arith.truncf %92 : vector<8x8xf32> to vector<8x8xbf16>
      %cst_60 = arith.constant dense<0.000000e+00> : vector<8x8xf32>
      %96 = tpu.matmul %95, %86, %cst_60 {dimension_numbers = #tpu.dot_dimension_numbers<[1], [0], [0], [1], [0, 0, 1, 1], [], []>} : vector<8x8xbf16>, vector<8x8xbf16>, vector<8x8xf32> -> vector<8x8xf32>
      %97 = tpu.reciprocal %94 : vector<8x1xf32> -> vector<8x1xf32>
      %98 = vector.broadcast %97 : vector<8x1xf32> to vector<8x8xf32>
      %99 = arith.mulf %96, %98 : vector<8x8xf32>
      %100 = arith.truncf %99 : vector<8x8xf32> to vector<8x8xbf16>
      %c0_61 = arith.constant 0 : index
      %c24_62 = arith.constant 24 : index
      %101 = vector.load %arg17[%c0_61, %c24_62] : memref<8x32xbf16, #tpu.memory_space<vmem>>, vector<8x8xbf16>
      tpu.vector_store %arg17[%c0_61, %c24_62], %100 {strides = array<i32>} : memref<8x32xbf16, #tpu.memory_space<vmem>>, vector<8x8xbf16>,
      %c0_63 = arith.constant 0 : index
      %c0_64 = arith.constant 0 : index
      %102 = vector.load %arg17[%c0_63, %c0_64] : memref<8x32xbf16, #tpu.memory_space<vmem>>, vector<8x32xbf16>
      %c0_65 = arith.constant 0 : index
      %c0_66 = arith.constant 0 : index
      %103 = vector.load %arg5[%c0_65, %c0_66] : memref<32x32xbf16, #tpu.memory_space<vmem>>, vector<32x32xbf16>
      %cst_67 = arith.constant dense<0.000000e+00> : vector<8x32xf32>
      %104 = tpu.matmul %102, %103, %cst_67 {dimension_numbers = #tpu.dot_dimension_numbers<[1], [0], [0], [1], [0, 0, 1, 1], [], []>} : vector<8x32xbf16>, vector<32x32xbf16>, vector<8x32xf32> -> vector<8x32xf32>
      %c0_68 = arith.constant 0 : index
      %c0_69 = arith.constant 0 : index
      %105 = vector.load %arg6[%c0_68, %c0_69] : memref<1x32xf32, #tpu.memory_space<vmem>>, vector<1x32xf32>
      %106 = vector.broadcast %105 : vector<1x32xf32> to vector<8x32xf32>
      %107 = arith.addf %104, %106 : vector<8x32xf32>
      %108 = arith.addf %21, %107 : vector<8x32xf32>
      %cst_70 = arith.constant dense<0.000000e+00> : vector<8xf32>
      %109 = vector.multi_reduction <add>, %108, %cst_70 [1] : vector<8x32xf32> to vector<8xf32>
      %110 = vector.shape_cast %109 : vector<8xf32> to vector<8x1xf32>
      %cst_71 = arith.constant 3.200000e+01 : f32
      %111 = vector.broadcast %cst_71 : f32 to vector<8x1xf32>
      %112 = arith.divf %110, %111 : vector<8x1xf32>
      %113 = vector.broadcast %112 : vector<8x1xf32> to vector<8x32xf32>
      %114 = arith.subf %108, %113 : vector<8x32xf32>
      %115 = arith.mulf %114, %114 : vector<8x32xf32>
      %cst_72 = arith.constant dense<0.000000e+00> : vector<8xf32>
      %116 = vector.multi_reduction <add>, %115, %cst_72 [1] : vector<8x32xf32> to vector<8xf32>
      %117 = vector.shape_cast %116 : vector<8xf32> to vector<8x1xf32>
      %cst_73 = arith.constant 3.200000e+01 : f32
      %118 = vector.broadcast %cst_73 : f32 to vector<8x1xf32>
      %119 = arith.divf %117, %118 : vector<8x1xf32>
      %120 = vector.broadcast %112 : vector<8x1xf32> to vector<8x32xf32>
      %121 = arith.subf %108, %120 : vector<8x32xf32>
      %cst_74 = arith.constant 9.99999974E-6 : f32
      %122 = vector.broadcast %cst_74 : f32 to vector<8x1xf32>
      %123 = arith.addf %119, %122 : vector<8x1xf32>
      %124 = math.rsqrt %123 : vector<8x1xf32>
      %125 = vector.broadcast %124 : vector<8x1xf32> to vector<8x32xf32>
      %126 = arith.mulf %121, %125 : vector<8x32xf32>
      %c0_75 = arith.constant 0 : index
      %c0_76 = arith.constant 0 : index
      %127 = vector.load %arg11[%c0_75, %c0_76] : memref<1x32xf32, #tpu.memory_space<vmem>>, vector<1x32xf32>
      %128 = vector.broadcast %127 : vector<1x32xf32> to vector<8x32xf32>
      %129 = arith.mulf %126, %128 : vector<8x32xf32>
      %c0_77 = arith.constant 0 : index
      %c0_78 = arith.constant 0 : index
      %130 = vector.load %arg12[%c0_77, %c0_78] : memref<1x32xf32, #tpu.memory_space<vmem>>, vector<1x32xf32>
      %131 = vector.broadcast %130 : vector<1x32xf32> to vector<8x32xf32>
      %132 = arith.addf %129, %131 : vector<8x32xf32>
      %c0_79 = arith.constant 0 : index
      %c0_80 = arith.constant 0 : index
      %133 = vector.load %arg18[%c0_79, %c0_80] : memref<8x32xf32, #tpu.memory_space<vmem>>, vector<8x32xf32>
      tpu.vector_store %arg18[%c0_79, %c0_80], %132 {strides = array<i32>} : memref<8x32xf32, #tpu.memory_space<vmem>>, vector<8x32xf32>,
      %134 = arith.truncf %132 : vector<8x32xf32> to vector<8x32xbf16>
      %c0_81 = arith.constant 0 : index
      %c0_82 = arith.constant 0 : index
      %135 = vector.load %arg19[%c0_81, %c0_82] : memref<8x32xbf16, #tpu.memory_space<vmem>>, vector<8x32xbf16>
      tpu.vector_store %arg19[%c0_81, %c0_82], %134 {strides = array<i32>} : memref<8x32xbf16, #tpu.memory_space<vmem>>, vector<8x32xbf16>,
      %cst_83 = arith.constant 0.000000e+00 : f32
      %136 = vector.broadcast %cst_83 : f32 to vector<8x32xf32>
      %c0_84 = arith.constant 0 : index
      %c0_85 = arith.constant 0 : index
      %137 = vector.load %arg20[%c0_84, %c0_85] : memref<8x32xf32, #tpu.memory_space<vmem>>, vector<8x32xf32>
      tpu.vector_store %arg20[%c0_84, %c0_85], %136 {strides = array<i32>} : memref<8x32xf32, #tpu.memory_space<vmem>>, vector<8x32xf32>,
    } else {
    }
    %c0 = arith.constant 0 : index
    %c0_1 = arith.constant 0 : index
    %3 = vector.load %arg19[%c0, %c0_1] : memref<8x32xbf16, #tpu.memory_space<vmem>>, vector<8x32xbf16>
    %c0_2 = arith.constant 0 : index
    %c0_3 = arith.constant 0 : index
    %4 = vector.load %arg7[%c0_2, %c0_3] : memref<32x64xbf16, #tpu.memory_space<vmem>>, vector<32x64xbf16>
    %cst = arith.constant dense<0.000000e+00> : vector<8x64xf32>
    %5 = tpu.matmul %3, %4, %cst {dimension_numbers = #tpu.dot_dimension_numbers<[1], [0], [0], [1], [0, 0, 1, 1], [], []>} : vector<8x32xbf16>, vector<32x64xbf16>, vector<8x64xf32> -> vector<8x64xf32>
    %c0_4 = arith.constant 0 : index
    %c0_5 = arith.constant 0 : index
    %6 = vector.load %arg8[%c0_4, %c0_5] : memref<1x64xf32, #tpu.memory_space<vmem>>, vector<1x64xf32>
    %7 = vector.broadcast %6 : vector<1x64xf32> to vector<8x64xf32>
    %8 = arith.addf %5, %7 : vector<8x64xf32>
    %cst_6 = arith.constant 0.000000e+00 : f32
    %9 = vector.broadcast %cst_6 : f32 to vector<8x64xf32>
    %10 = arith.maximumf %8, %9 : vector<8x64xf32>
    %11 = arith.truncf %10 : vector<8x64xf32> to vector<8x64xbf16>
    %c0_7 = arith.constant 0 : index
    %c0_8 = arith.constant 0 : index
    %12 = vector.load %arg20[%c0_7, %c0_8] : memref<8x32xf32, #tpu.memory_space<vmem>>, vector<8x32xf32>
    %c0_9 = arith.constant 0 : index
    %c0_10 = arith.constant 0 : index
    %13 = vector.load %arg9[%c0_9, %c0_10] : memref<64x32xbf16, #tpu.memory_space<vmem>>, vector<64x32xbf16>
    %cst_11 = arith.constant dense<0.000000e+00> : vector<8x32xf32>
    %14 = tpu.matmul %11, %13, %cst_11 {dimension_numbers = #tpu.dot_dimension_numbers<[1], [0], [0], [1], [0, 0, 1, 1], [], []>} : vector<8x64xbf16>, vector<64x32xbf16>, vector<8x32xf32> -> vector<8x32xf32>
    %15 = arith.addf %12, %14 : vector<8x32xf32>
    %c0_12 = arith.constant 0 : index
    %c0_13 = arith.constant 0 : index
    %16 = vector.load %arg20[%c0_12, %c0_13] : memref<8x32xf32, #tpu.memory_space<vmem>>, vector<8x32xf32>
    tpu.vector_store %arg20[%c0_12, %c0_13], %15 {strides = array<i32>} : memref<8x32xf32, #tpu.memory_space<vmem>>, vector<8x32xf32>,
    %c0_i32_14 = arith.constant 0 : i32
    %17 = arith.cmpi eq, %arg1, %c0_i32_14 : i32
    %18 = arith.extui %17 : i1 to i32
    %c0_i32_15 = arith.constant 0 : i32
    %19 = arith.cmpi ne, %18, %c0_i32_15 : i32
    scf.if %19 {
      %c0_16 = arith.constant 0 : index
      %c0_17 = arith.constant 0 : index
      %20 = vector.load %arg18[%c0_16, %c0_17] : memref<8x32xf32, #tpu.memory_space<vmem>>, vector<8x32xf32>
      %c0_18 = arith.constant 0 : index
      %c0_19 = arith.constant 0 : index
      %21 = vector.load %arg20[%c0_18, %c0_19] : memref<8x32xf32, #tpu.memory_space<vmem>>, vector<8x32xf32>
      %22 = arith.addf %20, %21 : vector<8x32xf32>
      %c0_20 = arith.constant 0 : index
      %c0_21 = arith.constant 0 : index
      %23 = vector.load %arg10[%c0_20, %c0_21] : memref<1x32xf32, #tpu.memory_space<vmem>>, vector<1x32xf32>
      %24 = vector.broadcast %23 : vector<1x32xf32> to vector<8x32xf32>
      %25 = arith.addf %22, %24 : vector<8x32xf32>
      %cst_22 = arith.constant dense<0.000000e+00> : vector<8xf32>
      %26 = vector.multi_reduction <add>, %25, %cst_22 [1] : vector<8x32xf32> to vector<8xf32>
      %27 = vector.shape_cast %26 : vector<8xf32> to vector<8x1xf32>
      %cst_23 = arith.constant 3.200000e+01 : f32
      %28 = vector.broadcast %cst_23 : f32 to vector<8x1xf32>
      %29 = arith.divf %27, %28 : vector<8x1xf32>
      %30 = vector.broadcast %29 : vector<8x1xf32> to vector<8x32xf32>
      %31 = arith.subf %25, %30 : vector<8x32xf32>
      %32 = arith.mulf %31, %31 : vector<8x32xf32>
      %cst_24 = arith.constant dense<0.000000e+00> : vector<8xf32>
      %33 = vector.multi_reduction <add>, %32, %cst_24 [1] : vector<8x32xf32> to vector<8xf32>
      %34 = vector.shape_cast %33 : vector<8xf32> to vector<8x1xf32>
      %cst_25 = arith.constant 3.200000e+01 : f32
      %35 = vector.broadcast %cst_25 : f32 to vector<8x1xf32>
      %36 = arith.divf %34, %35 : vector<8x1xf32>
      %37 = vector.broadcast %29 : vector<8x1xf32> to vector<8x32xf32>
      %38 = arith.subf %25, %37 : vector<8x32xf32>
      %cst_26 = arith.constant 9.99999974E-6 : f32
      %39 = vector.broadcast %cst_26 : f32 to vector<8x1xf32>
      %40 = arith.addf %36, %39 : vector<8x1xf32>
      %41 = math.rsqrt %40 : vector<8x1xf32>
      %42 = vector.broadcast %41 : vector<8x1xf32> to vector<8x32xf32>
      %43 = arith.mulf %38, %42 : vector<8x32xf32>
      %c0_27 = arith.constant 0 : index
      %c0_28 = arith.constant 0 : index
      %44 = vector.load %arg13[%c0_27, %c0_28] : memref<1x32xf32, #tpu.memory_space<vmem>>, vector<1x32xf32>
      %45 = vector.broadcast %44 : vector<1x32xf32> to vector<8x32xf32>
      %46 = arith.mulf %43, %45 : vector<8x32xf32>
      %c0_29 = arith.constant 0 : index
      %c0_30 = arith.constant 0 : index
      %47 = vector.load %arg14[%c0_29, %c0_30] : memref<1x32xf32, #tpu.memory_space<vmem>>, vector<1x32xf32>
      %48 = vector.broadcast %47 : vector<1x32xf32> to vector<8x32xf32>
      %49 = arith.addf %46, %48 : vector<8x32xf32>
      %c0_31 = arith.constant 0 : index
      %c0_32 = arith.constant 0 : index
      %c0_33 = arith.constant 0 : index
      %50 = vector.load %arg15[%c0_31, %c0_32, %c0_33] : memref<1x8x32xf32, #tpu.memory_space<vmem>>, vector<1x8x32xf32>
      %51 = vector.shape_cast %50 : vector<1x8x32xf32> to vector<8x32xf32>
      %52 = vector.shape_cast %49 : vector<8x32xf32> to vector<1x8x32xf32>
      tpu.vector_store %arg15[%c0_31, %c0_32, %c0_33], %52 {strides = array<i32>} : memref<1x8x32xf32, #tpu.memory_space<vmem>>, vector<1x8x32xf32>,
    } else {
    }
    return
  }
  func.func @transform_0(%arg0: i32, %arg1: i32) -> (i32, i32, i32) {
    %c0_i32 = arith.constant 0 : i32
    %c0_i32_0 = arith.constant 0 : i32
    %c0_i32_1 = arith.constant 0 : i32
    return %arg0, %c0_i32, %c0_i32_0 : i32, i32, i32
  }
  func.func @transform_1(%arg0: i32, %arg1: i32) -> (i32, i32) {
    %c0_i32 = arith.constant 0 : i32
    %c0_i32_0 = arith.constant 0 : i32
    %c0_i32_1 = arith.constant 0 : i32
    return %c0_i32, %c0_i32_0 : i32, i32
  }
  func.func @transform_2(%arg0: i32, %arg1: i32) -> (i32, i32) {
    %c0_i32 = arith.constant 0 : i32
    %c0_i32_0 = arith.constant 0 : i32
    %c0_i32_1 = arith.constant 0 : i32
    return %c0_i32, %c0_i32_0 : i32, i32
  }
  func.func @transform_3(%arg0: i32, %arg1: i32) -> (i32, i32) {
    %c0_i32 = arith.constant 0 : i32
    %c0_i32_0 = arith.constant 0 : i32
    %c0_i32_1 = arith.constant 0 : i32
    return %c0_i32, %c0_i32_0 : i32, i32
  }
  func.func @transform_4(%arg0: i32, %arg1: i32) -> (i32, i32) {
    %c0_i32 = arith.constant 0 : i32
    %c0_i32_0 = arith.constant 0 : i32
    %c0_i32_1 = arith.constant 0 : i32
    return %c0_i32, %c0_i32_0 : i32, i32
  }
  func.func @transform_5(%arg0: i32, %arg1: i32) -> (i32, i32) {
    %c0_i32 = arith.constant 0 : i32
    %c0_i32_0 = arith.constant 0 : i32
    return %c0_i32, %arg1 : i32, i32
  }
  func.func @transform_6(%arg0: i32, %arg1: i32) -> (i32, i32) {
    %c0_i32 = arith.constant 0 : i32
    %c0_i32_0 = arith.constant 0 : i32
    return %c0_i32, %arg1 : i32, i32
  }
  func.func @transform_7(%arg0: i32, %arg1: i32) -> (i32, i32) {
    %c0_i32 = arith.constant 0 : i32
    %c0_i32_0 = arith.constant 0 : i32
    return %arg1, %c0_i32 : i32, i32
  }
  func.func @transform_8(%arg0: i32, %arg1: i32) -> (i32, i32) {
    %c0_i32 = arith.constant 0 : i32
    %c0_i32_0 = arith.constant 0 : i32
    %c0_i32_1 = arith.constant 0 : i32
    return %c0_i32, %c0_i32_0 : i32, i32
  }
  func.func @transform_9(%arg0: i32, %arg1: i32) -> (i32, i32) {
    %c0_i32 = arith.constant 0 : i32
    %c0_i32_0 = arith.constant 0 : i32
    %c0_i32_1 = arith.constant 0 : i32
    return %c0_i32, %c0_i32_0 : i32, i32
  }
  func.func @transform_10(%arg0: i32, %arg1: i32) -> (i32, i32) {
    %c0_i32 = arith.constant 0 : i32
    %c0_i32_0 = arith.constant 0 : i32
    %c0_i32_1 = arith.constant 0 : i32
    return %c0_i32, %c0_i32_0 : i32, i32
  }
  func.func @transform_11(%arg0: i32, %arg1: i32) -> (i32, i32) {
    %c0_i32 = arith.constant 0 : i32
    %c0_i32_0 = arith.constant 0 : i32
    %c0_i32_1 = arith.constant 0 : i32
    return %c0_i32, %c0_i32_0 : i32, i32
  }
  func.func @transform_12(%arg0: i32, %arg1: i32) -> (i32, i32) {
    %c0_i32 = arith.constant 0 : i32
    %c0_i32_0 = arith.constant 0 : i32
    %c0_i32_1 = arith.constant 0 : i32
    return %c0_i32, %c0_i32_0 : i32, i32
  }
  func.func @transform_13(%arg0: i32, %arg1: i32) -> (i32, i32, i32) {
    %c0_i32 = arith.constant 0 : i32
    %c0_i32_0 = arith.constant 0 : i32
    %c0_i32_1 = arith.constant 0 : i32
    return %arg0, %c0_i32, %c0_i32_0 : i32, i32, i32
  }
}

</mosaic_0001>

<bundles_post_ra>
// kernel: tpu_custom_call.1
= control target key start
LH: loop header
LB: loop body
LE: loop exit
PB: predicated region body
PF: predicated region fallthrough
CT: control target
= control target key end

     0   :  { %s2238_s0 = inlined_call_operand.vmem [shape: f32[2,8,32], index: 0, kind: input, shape index: {}]   ;;  %s2239_s1 = inlined_call_operand.vmem [shape: bf16[32,96], index: 1, kind: input, shape index: {}]   ;;  %s2240_s2 = inlined_call_operand.vmem [shape: f32[1,96], index: 2, kind: input, shape index: {}]   ;;  %s2241_s3 = inlined_call_operand.vmem [shape: bf16[32,32], index: 3, kind: input, shape index: {}]   ;;  %s2242_s4 = inlined_call_operand.vmem [shape: f32[1,32], index: 4, kind: input, shape index: {}]   ;;  %s2243_s5 = inlined_call_operand.hbm [shape: bf16[32,64], index: 5, kind: input, shape index: {}]   ;;  %s2244_s6 = inlined_call_operand.vmem [shape: f32[1,64], index: 6, kind: input, shape index: {}]   ;;  %s2245_s7 = inlined_call_operand.vmem [shape: bf16[64,32], index: 7, kind: input, shape index: {}]   ;;  %s2246_s8 = inlined_call_operand.vmem [shape: f32[1,32], index: 8, kind: input, shape index: {}]   ;;  %s2247_s9 = inlined_call_operand.vmem [shape: f32[1,32], index: 9, kind: input, shape index: {}]   ;;  %s2248_s10 = inlined_call_operand.vmem [shape: f32[1,32], index: 10, kind: input, shape index: {}]   ;;  %s2249_s11 = inlined_call_operand.vmem [shape: f32[1,32], index: 11, kind: input, shape index: {}]   ;;  %s2250_s12 = inlined_call_operand.vmem [shape: f32[1,32], index: 12, kind: input, shape index: {}]   ;;  %s2251_s13 = inlined_call_operand.hbm [shape: f32[2,8,32], index: 13, kind: output, shape index: {}]  }
   0x1   :  { %2254 = sst [smem:[#allocation15_spill]] %s2238_s0 }
   0x2   :  { %2255 = sst [smem:[#allocation16_spill]] %s2239_s1 }
   0x3   :  { %2256 = sst [smem:[#allocation17_spill]] %s2240_s2 }
   0x4   :  { %2257 = sst [smem:[#allocation18_spill]] %s2241_s3 }
   0x5   :  { %18 = vsyncpa [#allocation8], 0 }
   0x6   :  { %19 = vsyncpa [#allocation9], 0 }
   0x7   :  { %21 = vsyncpa [#allocation9 + $0x1], 0  ;;  %s1973_s25 = smov 0   ;;  %s1975_s26 = smov 0  }
   0x8   :  { %s1977_s27 = smov 0   ;;  %s1979_s28 = smov 0  }
   0x9   :  { %s1981_s29 = smov 0   ;;  %s1983_s30 = smov 0  }
   0xa LB: > { %2258 = sst [smem:[#allocation13_spill]] %s1877_s29  ;;  %s1488_s14 = sadd.s32 4294967295, %s1881_s30   ;;  %s1881_s30 = sphi %s1983_s30, %s27_s30   ;;  %s1877_s29 = sphi %s1981_s29, %s2269_s29   ;;  %s1873_s28 = sphi %s1979_s28, %s2268_s28   ;;  %s1869_s27 = sphi %s1977_s27, %s2272_s27   ;;  %s1865_s26 = sphi %s1975_s26, %s2271_s26   ;;  %s1861_s25 = sphi %s1973_s25, %s2270_s25  }
   0xb   : > { %s1489_s15 = sadd.s32 4294967294, %s1881_s30   ;;  %s39_s16 = sadd.s32 1, %s1877_s29 }
   0xc   : > { %s339_s17 = sadd.s32 1, %s1869_s27  ;;  %p41_p0 = scmp.ge.s32.totalorder %s39_s16, 2 }
   0xd   : > { %p349_p1 = scmp.ne.s32.totalorder %s1869_s27, %s1865_s26  ;;  %p350_p2 = scmp.eq.s32.totalorder %s1488_s14, 1 }
   0xe   : > { %p355_p3 = scmp.ne.s32.totalorder %s1865_s26, %s1861_s25  ;;  %s2274_s16 = smov (%p41_p0, %s39_s16), 0 }
   0xf   : > { %2259 = sst [smem:[#allocation14_spill]] %s2274_s16  ;;  %p2013_p4 = por %p350_p2, %p349_p1 }
  0x10   : > { %p356_p5 = scmp.eq.s32.totalorder %s1489_s15, 1  ;;  %s336_s19 = ssub.s32 %s1877_s29, %s2274_s16 }
  0x11   : > { %p1490_p6 = scmp.ge.s32.totalorder %s1881_s30, 1  ;;  %p337_p7 = scmp.eq.s32.totalorder %s336_s19, 0 }
  0x12   : > { %p2020_p8 = por %p356_p5, %p355_p3  ;;  %p363_p9 = scmp.lt.s32.totalorder %s1881_s30, 3 }
  0x13   : > { %s2026_s21 = scalar_select %p337_p7, %s1869_s27, %s339_s17  }
  0x14   : > { %p2028_p10 = pnand %p1490_p6, %p363_p9  ;;  %p2032_p11 = scmp.eq.s32.totalorder %s1488_s14, 0 }
  0x15   : > { %s1883_s24 = smov [#allocation7]  }
  0x16   : > { %p1663_p12 = pneg %p2028_p10  ;;  %s389_s15 = sshll.u32 %s1883_s24, 4  ;;  %s390_s15 = int_to_ptr.vmem [resolvable:$true] %s389_s15 }
  0x17   : > { %s1786_s17 = scalar_lea.vmem %s390_s15, 256  ;;  %p1794_p5 = scmp.lt.s32.totalorder %s390_s15, %s390_s15 }
  0x18   : > { %p1664_p13 = pnand %p2032_p11, %p1663_p12  ;;  %p1787_p1 = scmp.ne.s32.totalorder %s390_s15, %s1786_s17 }
  0x19   : > { %p1795_p6 = scmp.lt.s32.totalorder %s1786_s17, %s1786_s17 }
  0x1a   : > { %p1777_p0 = pneg %p1664_p13 }
  0x1b   : > { %p1796_p7 = por %p1795_p6, %p1794_p5 }
  0x1c   : > { %p1789_p2 = pnand %p1787_p1, %p1777_p0 }
  0x1e   : > { %p1790_p3 = pneg %p1789_p2 }
  0x20   : > { %p1797_p9 = pnand %p1796_p7, %p1790_p3 }
  0x22   : > { %1800 = shalt.err (!%p1797_p9)
}
  0x23   : > { %s1884_s14 = smov 64   ;;  %s1885_s19 = smov 4  }
  0x24   : > { %1666 = dma.hbm_to_vmem [thread:$0]  (!%p1664_p13), %s2243_s5, 256, %s390_s15, [#allocation8], %s1884_s14, %s1884_s14, %s1885_s19  }
  0x25   : > { %442 = sbr.rel (%p2028_p10) target bundleno = 2358 (0x936), region = 72 }
  0x2a   : > { %1852 = dma.done.wait (%p2032_p11), [#allocation8], 256  }
  0x2b   : > { %1854 = vsyncadd (%p2032_p11), [#allocation8], 4294967040  ;;  %p493_p12 = scmp.lt.s32.totalorder %s1873_s28, 1  ;;  %vm536_vm0 = vcmask 261120   ;;  %v1886_v0 = vmov 0.0   ;;  %vm1887_vm1 = vmmov 0  }
  0x2c   : > { %1573 = vmatprep.subr.bf16.mxu0 %v1886_v0  ;;  %1577 = vmatprep.mubr.msk.bf16.mxu0 %vm1887_vm1, %v1886_v0  ;;  %1171 = vst.msk [vmem:[#allocation6] sm:$0xff] %vm536_vm0, %v1886_v0  ;;  %s2264_s0 = sld [smem:[#allocation15_spill]]  ;;  %vm581_vm2 = vcmask 781312   ;;  %s1888_s22 = smov 120   ;;  %vm589_vm3 = vcmask 64512   ;;  %vm651_vm4 = vcmask 1043456  }
  0x2d   : > { %s494_s29 = scalar_select %p493_p12, %s1873_s28, 1  ;;  %1581 = vmatprep.subr.bf16.mxu1 %v1886_v0  ;;  %1583 = vmatprep.mubr.msk.bf16.mxu1 %vm1887_vm1, %v1886_v0  ;;  %vm698_vm5 = vcmask 60416   ;;  %vm821_vm6 = vcmask 126016   ;;  %vm944_vm7 = vcmask 191616   ;;  %vm1067_vm8 = vcmask 257216  }
  0x2e   : > { %s2265_s1 = sld [smem:[#allocation16_spill]]  ;;  %s1889_s23 = smov 96   ;;  %vm1169_vm9 = vcmask 257024   ;;  %vm1275_vm10 = vcmask 523264  }
  0x2f   : > { %s1498_s16 = sshll.u32 %s494_s29, 3  ;;  %s2266_s2 = sld [smem:[#allocation17_spill]] }
  0x30   : > { %s1891_s15 = smov 88   ;;  %s1892_s17 = smov 72  }
  0x31   : > { %s1893_s14 = smov 112   ;;  %s1894_s19 = smov 104  }
  0x32   : > { %s496_s24 = scalar_lea.vmem %s2264_s0, %s1498_s16  ;;  %s1895_s29 = smov 56  }
  0x33   : > { %v2068_v3 = vld [vmem:[%s496_s24] sm:$0xff]  ;;  %s1890_s24 = smov 80   ;;  %s1896_s16 = smov 64  }
  0x34   : > { %v1741_v1 = vld [vmem:[%s2265_s1 + $0x8] sm:$0xff]   ;;  %v1742_v2 = vld [vmem:[%s2265_s1] sm:$0xff]   ;;  %v512_v4 = vpack.c.bf16 %v2068_v3, %v2068_v3  ;;  %s2267_s3 = sld [smem:[#allocation18_spill]] }
  0x35   : > { %1574 = vmatpush3.bf16.msra.mxu0 %v1741_v1  ;;  %v1499_v5 = vld [vmem:[%s2266_s2] ss:$0 sm:$0xff] }
  0x36   : > { %1575 = vmatprep.subr.bf16.mxu0 %v1886_v0 }
  0x39   : > { %1576 = vmatpush3.bf16.msra.mxu0 %v1742_v2 }
  0x3a   : > { %1587 = vmatprep.subr.bf16.mxu0 %v1886_v0 }
  0x3c   : > { %1578 = vmatmul.mubr.msk.bf16.vlgmr.msra.gmra.mxu0 %vm536_vm0, %v512_v4 }
  0x3d   : > { %1589 = vmatprep.mubr.msk.bf16.mxu0 %vm1887_vm1, %v1886_v0 }
  0xfc   : > { %v574_v6 = vpop.f32.mrf.mxu0 }
  0xfd   : > { %v575_v7 = vadd.f32 %v1499_v5, %v574_v6 }
  0xfe   : > { %v1579_v8 = vpop.f32.mrf.mxu0 }
  0xff   : > { %v580_v9 = vpack.c.bf16 %v575_v7, %v575_v7 }
 0x100   : > { %v577_v10 = vpop.f32.mrf.mxu0 }
 0x101   : > { %582 = vst.msk [vmem:[#allocation2] sm:$0xf] %vm581_vm2, %v580_v9 }
 0x102   : > { %v1580_v11 = vpop.f32.mrf.mxu0 }
 0x108   : > { %v2080_v12 = vld [vmem:[#allocation2] ss:$0 sps:$4 sm:$0xff]  }
 0x109   : > { %v583_v13 = vld [vmem:[#allocation2] sm:$0xf]  ;;  %704 = vrot.lane.b32.xlu1 %v2080_v12, %s1888_s22  ;;  %s1897_s22 = smov 40  }
 0x10a   : > { %v2082_v14 = vcombine.low %v583_v13, %v583_v13  ;;  %v2086_v15 = vld [vmem:[#allocation2] ss:$0 sps:$4 sm:$0xff]  }
 0x10b   : > { %v1746_v16 = vld [vmem:[#allocation2] ss:$0 sps:$4 sm:$0xff]  }
 0x10c   : > { %587 = vrot.lane.b32.xlu0 %v2082_v14, %s1889_s23  ;;  %s1898_s23 = smov 48  }
 0x10d   : > { %829 = vrot.lane.b32.xlu1 %v2086_v15, %s1890_s24  ;;  %s1899_s24 = smov 8  }
 0x110   : > { %706 = vrot.lane.b32.xlu0 %v2080_v12, %s1891_s15  ;;  %s1902_s15 = smov [#allocation10]  }
 0x111   : > { %952 = vrot.lane.b32.xlu1 %v1746_v16, %s1892_s17  ;;  %s1805_s17 = sshll.u32 %s1902_s15, 4  ;;  %s1806_s17 = int_to_ptr.vmem [resolvable:$false] %s1805_s17 }
 0x114   : > { %827 = vrot.lane.b32.xlu0 %v2086_v15, %s1893_s14  ;;  %s1900_s14 = smov 16  }
 0x118   : > { %950 = vrot.lane.b32.xlu0 %v1746_v16, %s1894_s19  ;;  %s1537_s19 = sshll.u32 %s1873_s28, 7  ;;  %s1807_s28 = scalar_lea.vmem %s1806_s17, 256 }
 0x119   : > { %s1378_s2 = scalar_lea.hbm %s2251_s13, %s1537_s19 }
 0x17b   : > { %v705_v20 = vpop.permute.xlu1 %704 }
 0x17e   : > { %v588_v17 = vpop.permute.xlu0 %587 }
 0x17f   : > { %v594_v18 = vsel %vm589_vm3, %v588_v17, 0  ;;  %v830_v22 = vpop.permute.xlu1 %829 }
 0x180   : > { %1582 = vmatpush3.bf16.xpose.msra.mxu1 %v594_v18  ;;  %v835_v23 = vsel %vm589_vm3, %v830_v22, 0 }
 0x181   : > { %1593 = vmatprep.subr.bf16.mxu1 %v1886_v0 }
 0x182   : > { %v707_v19 = vpop.permute.xlu0 %706 }
 0x183   : > { %v712_v21 = vsel %vm589_vm3, %v707_v19, 0  ;;  %v953_v24 = vpop.permute.xlu1 %952 }
 0x184   : > { %v958_v26 = vsel %vm589_vm3, %v953_v24, 0 }
 0x186   : > { %v828_v25 = vpop.permute.xlu0 %827 }
 0x187   : > { %1584 = vmatmul.mubr.msk.bf16.vlgmr.msra.gmra.mxu1 %vm589_vm3, %v583_v13 }
 0x188   : > { %1594 = vmatpush3.bf16.xpose.msra.mxu1 %v712_v21  ;;  %1595 = vmatprep.mubr.msk.bf16.mxu1 %vm1887_vm1, %v1886_v0 }
 0x189   : > { %1605 = vmatprep.subr.bf16.mxu1 %v1886_v0 }
 0x18a   : > { %v951_v27 = vpop.permute.xlu0 %950 }
 0x18f   : > { %1596 = vmatmul.mubr.msk.bf16.vlgmr.msra.gmra.mxu1 %vm589_vm3, %v705_v20 }
 0x190   : > { %1606 = vmatpush3.bf16.xpose.msra.mxu1 %v835_v23  ;;  %1607 = vmatprep.mubr.msk.bf16.mxu1 %vm1887_vm1, %v1886_v0 }
 0x191   : > { %1617 = vmatprep.subr.bf16.mxu1 %v1886_v0 }
 0x197   : > { %1608 = vmatmul.mubr.msk.bf16.vlgmr.msra.gmra.mxu1 %vm589_vm3, %v828_v25 }
 0x198   : > { %1618 = vmatpush3.bf16.xpose.msra.mxu1 %v958_v26  ;;  %1619 = vmatprep.mubr.msk.bf16.mxu1 %vm1887_vm1, %v1886_v0 }
 0x199   : > { %1629 = vmatprep.subr.bf16.mxu1 %v1886_v0 }
 0x19f   : > { %1620 = vmatmul.mubr.msk.bf16.vlgmr.msra.gmra.mxu1 %vm589_vm3, %v951_v27 }
 0x1a0   : > { %1633 = vmatprep.mubr.msk.bf16.mxu1 %vm1887_vm1, %v1886_v0 }
 0x247   : > { %v630_v28 = vpop.f32.mrf.mxu1 }
 0x248   : > { %v636_v29 = vsel %vm589_vm3, %v630_v28, -inf }
 0x249   : > { %637 = vmax.xlane.f32.xlu1 %v636_v29  ;;  %v1585_v30 = vpop.f32.mrf.mxu1 }
 0x24b   : > { %v633_v31 = vpop.f32.mrf.mxu1 }
 0x24d   : > { %v1586_v32 = vpop.f32.mrf.mxu1 }
 0x24f   : > { %v748_v33 = vpop.f32.mrf.mxu1 }
 0x250   : > { %v754_v34 = vsel %vm589_vm3, %v748_v33, -inf }
 0x251   : > { %755 = vmax.xlane.f32.xlu0 %v754_v34  ;;  %v1597_v35 = vpop.f32.mrf.mxu1 }
 0x253   : > { %v751_v36 = vpop.f32.mrf.mxu1 }
 0x255   : > { %v1598_v37 = vpop.f32.mrf.mxu1 }
 0x257   : > { %v871_v38 = vpop.f32.mrf.mxu1 }
 0x258   : > { %v877_v39 = vsel %vm589_vm3, %v871_v38, -inf }
 0x259   : > { %878 = vmax.xlane.f32.xlu0 %v877_v39  ;;  %v1609_v40 = vpop.f32.mrf.mxu1 }
 0x25a   : > { %764 = vrot.lane.b32.xlu1 %v2080_v12, %s1895_s29 }
 0x25b   : > { %v874_v41 = vpop.f32.mrf.mxu1 }
 0x25d   : > { %v1610_v42 = vpop.f32.mrf.mxu1 }
 0x25e   : > { %v1747_v42 = vld [vmem:[%s2267_s3 + $0x8] sm:$0xff]  }
 0x25f   : > { %v994_v43 = vpop.f32.mrf.mxu1  ;;  %1630 = vmatpush3.bf16.msra.mxu1 %v1747_v42 }
 0x260   : > { %v1000_v47 = vsel %vm589_vm3, %v994_v43, -inf  ;;  %1631 = vmatprep.subr.bf16.mxu1 %v1886_v0 }
 0x261   : > { %v1621_v44 = vpop.f32.mrf.mxu1 }
 0x262   : > { %v1748_v44 = vld [vmem:[%s2267_s3] sm:$0xff]  }
 0x263   : > { %v997_v45 = vpop.f32.mrf.mxu1  ;;  %1632 = vmatpush3.bf16.msra.mxu1 %v1748_v44 }
 0x264   : > { %1645 = vmatprep.subr.bf16.mxu1 %v1886_v0 }
 0x265   : > { %v1622_v46 = vpop.f32.mrf.mxu1 }
 0x26f   : > { %646 = vrot.lane.b32.xlu0 %v2082_v14, %s1896_s16  ;;  %s1901_s16 = smov 24  }
 0x273   : > { %1010 = vrot.lane.b32.xlu0 %v1746_v16, %s1897_s22  ;;  %s490_s22 = sand.u32 1, %s1865_s26  }
 0x274   : > { %s1367_s3 = scalar_lea.sflag [#allocation9], %s490_s22 }
 0x27e   : > { %1001 = vmax.xlane.f32.xlu1 %v1000_v47 }
 0x28f   : > { %887 = vrot.lane.b32.xlu1 %v2086_v15, %s1898_s23  ;;  %s1497_s23 = sshll.u32 %s490_s22, 3 }
 0x290   : > { %s492_s29 = scalar_lea.vmem [#allocation10], %s1497_s23 }
 0x2d2   : > { %v638_v48 = vpop.xlane.xlu1 %637 }
 0x2d3   : > { %v639_v49 = vsub.f32 %v630_v28, %v638_v48 }
 0x2d5   : > { %v640_v50 = vmul.f32 1.442695, %v639_v49 }
 0x2d6   : > { %v765_v60 = vpop.permute.xlu1 %764 }
 0x2d7   : > { %1755 = vpow2.f32 %v640_v50  ;;  %v770_v62 = vsel %vm651_vm4, %v765_v60, 0 }
 0x2da   : > { %v756_v51 = vpop.xlane.xlu0 %755 }
 0x2db   : > { %v757_v52 = vsub.f32 %v748_v33, %v756_v51 }
 0x2dd   : > { %v758_v53 = vmul.f32 1.442695, %v757_v52 }
 0x2df   : > { %1757 = vpow2.f32 %v758_v53 }
 0x2e2   : > { %v879_v54 = vpop.xlane.xlu0 %878 }
 0x2e3   : > { %v880_v55 = vsub.f32 %v871_v38, %v879_v54 }
 0x2e4   : > { %v1756_v57 = vpop.eup %1755 }
 0x2e5   : > { %v881_v56 = vmul.f32 1.442695, %v880_v55  ;;  %v645_v61 = vpack.c.bf16 %v1756_v57, %v1756_v57  ;;  %v642_v2 = vsel %vm589_vm3, %v1756_v57, 0.0 }
 0x2e6   : > { %v647_v58 = vpop.permute.xlu0 %646 }
 0x2e7   : > { %1759 = vpow2.f32 %v881_v56  ;;  %v653_v59 = vsel %vm651_vm4, %v647_v58, 0  ;;  %v1518_v56 = vld [vmem:[%s2242_s4] ss:$0 sm:$0xff] }
 0x2e8   : > { %1588 = vmatpush3.bf16.msra.mxu0 %v653_v59 }
 0x2e9   : > { %1599 = vmatprep.subr.bf16.mxu0 %v1886_v0 }
 0x2ea   : > { %v1011_v12 = vpop.permute.xlu0 %1010 }
 0x2eb   : > { %1590 = vmatmul.mubr.msk.bf16.vlgmr.msra.gmra.mxu0 %vm589_vm3, %v645_v61  ;;  %v1016_v14 = vsel %vm651_vm4, %v1011_v12, 0 }
 0x2ec   : > { %v1758_v63 = vpop.eup %1757  ;;  %1600 = vmatpush3.bf16.msra.mxu0 %v770_v62  ;;  %1601 = vmatprep.mubr.msk.bf16.mxu0 %vm1887_vm1, %v1886_v0 }
 0x2ed   : > { %v760_v1 = vsel %vm589_vm3, %v1758_v63, 0.0  ;;  %1611 = vmatprep.subr.bf16.mxu0 %v1886_v0  ;;  %v763_v4 = vpack.c.bf16 %v1758_v63, %v1758_v63 }
 0x2ee   : > { %761 = vadd.xlane.f32.xlu1 %v760_v1 }
 0x2f2   : > { %643 = vadd.xlane.f32.xlu1 %v642_v2 }
 0x2f3   : > { %1602 = vmatmul.mubr.msk.bf16.vlgmr.msra.gmra.mxu0 %vm589_vm3, %v763_v4 }
 0x2f4   : > { %v1760_v5 = vpop.eup %1759  ;;  %1613 = vmatprep.mubr.msk.bf16.mxu0 %vm1887_vm1, %v1886_v0 }
 0x2f5   : > { %v883_v6 = vsel %vm589_vm3, %v1760_v5, 0.0  ;;  %v886_v13 = vpack.c.bf16 %v1760_v5, %v1760_v5 }
 0x2f6   : > { %884 = vadd.xlane.f32.xlu0 %v883_v6 }
 0x307   : > { %v1002_v7 = vpop.xlane.xlu1 %1001 }
 0x308   : > { %v1003_v8 = vsub.f32 %v994_v43, %v1002_v7  ;;  %v1749_v7 = vld [vmem:[#allocation7 + $0x8] sm:$0xff]  }
 0x30a   : > { %v1004_v9 = vmul.f32 1.442695, %v1003_v8  ;;  %v1750_v8 = vld [vmem:[#allocation7] sm:$0xff]  }
 0x30b   : > { %v888_v10 = vpop.permute.xlu1 %887 }
 0x30c   : > { %1761 = vpow2.f32 %v1004_v9  ;;  %v893_v11 = vsel %vm651_vm4, %v888_v10, 0  ;;  %v1752_v9 = vld [vmem:[%s2245_s7 + $0x10] sm:$0xff]  }
 0x30d   : > { %1612 = vmatpush3.bf16.msra.mxu0 %v893_v11 }
 0x30e   : > { %1623 = vmatprep.subr.bf16.mxu0 %v1886_v0 }
 0x310   : > { %1614 = vmatmul.mubr.msk.bf16.vlgmr.msra.gmra.mxu0 %vm589_vm3, %v886_v13 }
 0x311   : > { %1624 = vmatpush3.bf16.msra.mxu0 %v1016_v14  ;;  %1625 = vmatprep.mubr.msk.bf16.mxu0 %vm1887_vm1, %v1886_v0  ;;  %v1522_v14 = vld [vmem:[%s2247_s9] ss:$0 sm:$0xff] }
 0x312   : > { %1637 = vmatprep.subr.bf16.mxu0 %v1886_v0 }
 0x319   : > { %v1762_v15 = vpop.eup %1761 }
 0x31a   : > { %v1006_v16 = vsel %vm589_vm3, %v1762_v15, 0.0  ;;  %v1009_v17 = vpack.c.bf16 %v1762_v15, %v1762_v15 }
 0x31b   : > { %1007 = vadd.xlane.f32.xlu0 %v1006_v16  ;;  %v1523_v16 = vld [vmem:[%s2248_s10] ss:$0 sm:$0xff] }
 0x31c   : > { %1626 = vmatmul.mubr.msk.bf16.vlgmr.msra.gmra.mxu0 %vm589_vm3, %v1009_v17 }
 0x31d   : > { %1641 = vmatprep.mubr.msk.bf16.mxu0 %vm1887_vm1, %v1886_v0  ;;  %1638 = vmatpush3.bf16.msra.mxu0 %v1749_v7 }
 0x31e   : > { %1639 = vmatprep.subr.bf16.mxu0 %v1886_v0 }
 0x321   : > { %1640 = vmatpush3.bf16.msra.mxu0 %v1750_v8 }
 0x377   : > { %v762_v18 = vpop.xlane.xlu1 %761 }
 0x37b   : > { %v644_v19 = vpop.xlane.xlu1 %643 }
 0x37c   : > { %1763 = vrcp.f32 %v644_v19 }
 0x37d   : > { %1765 = vrcp.f32 %v762_v18 }
 0x37f   : > { %v885_v34 = vpop.xlane.xlu0 %884 }
 0x380   : > { %1767 = vrcp.f32 %v885_v34 }
 0x389   : > { %v1764_v20 = vpop.eup %1763 }
 0x38a   : > { %v1766_v27 = vpop.eup %1765 }
 0x38d   : > { %v1768_v36 = vpop.eup %1767 }
 0x3a4   : > { %v1008_v35 = vpop.xlane.xlu0 %1007 }
 0x3a5   : > { %1769 = vrcp.f32 %v1008_v35 }
 0x3ab   : > { %v689_v21 = vpop.f32.mrf.mxu0 }
 0x3ac   : > { %v696_v22 = vmul.f32 %v1764_v20, %v689_v21  ;;  %v1753_v21 = vld [vmem:[%s2245_s7 + $0x8] sm:$0xff]  }
 0x3ad   : > { %v1591_v23 = vpop.f32.mrf.mxu0 }
 0x3ae   : > { %v697_v24 = vpack.c.bf16 %v696_v22, %v696_v22  ;;  %v1754_v22 = vld [vmem:[%s2245_s7] sm:$0xff]  }
 0x3af   : > { %v692_v25 = vpop.f32.mrf.mxu0  ;;  %v1524_v23 = vld [vmem:[%s2244_s6] ss:$0 sm:$0xff] }
 0x3b0   : > { %699 = vst.msk [vmem:[#allocation3] sm:$0xf] %vm698_vm5, %v697_v24 }
 0x3b1   : > { %v1592_v26 = vpop.f32.mrf.mxu0 }
 0x3b2   : > { %v1770_v45 = vpop.eup %1769 }
 0x3b3   : > { %v806_v28 = vpop.f32.mrf.mxu0 }
 0x3b4   : > { %v813_v29 = vmul.f32 %v1766_v27, %v806_v28 }
 0x3b5   : > { %v1603_v30 = vpop.f32.mrf.mxu0 }
 0x3b6   : > { %v1540_v31 = vpack.c.bf16 %v813_v29, %v813_v29 }
 0x3b7   : > { %v809_v32 = vpop.f32.mrf.mxu0 }
 0x3b8   : > { %818 = vrot.lane.b32.xlu0 %v1540_v31, %s1899_s24  ;;  %v1242_v31 = vld [vmem:[#allocation6] sm:$0xff] }
 0x3b9   : > { %v1604_v33 = vpop.f32.mrf.mxu0 }
 0x3d0   : > { %v929_v37 = vpop.f32.mrf.mxu0 }
 0x3d1   : > { %v936_v38 = vmul.f32 %v1768_v36, %v929_v37 }
 0x3d2   : > { %v1615_v39 = vpop.f32.mrf.mxu0 }
 0x3d3   : > { %v1541_v40 = vpack.c.bf16 %v936_v38, %v936_v38  ;;  %v1533_v38 = vld [vmem:[%s2246_s8] ss:$0 sm:$0xff] }
 0x3d4   : > { %v932_v41 = vpop.f32.mrf.mxu0 }
 0x3d5   : > { %941 = vrot.lane.b32.xlu1 %v1541_v40, %s1900_s14 }
 0x3d6   : > { %v1616_v43 = vpop.f32.mrf.mxu0 }
 0x3dc   : > { %v1052_v46 = vpop.f32.mrf.mxu0 }
 0x3dd   : > { %v1059_v47 = vmul.f32 %v1770_v45, %v1052_v46 }
 0x3de   : > { %v1627_v48 = vpop.f32.mrf.mxu0 }
 0x3df   : > { %v1542_v49 = vpack.c.bf16 %v1059_v47, %v1059_v47 }
 0x3e0   : > { %v1055_v50 = vpop.f32.mrf.mxu0 }
 0x3e1   : > { %1064 = vrot.lane.b32.xlu1 %v1542_v49, %s1901_s16  ;;  %s1380_s16 = sshll.u32 %s492_s29, 4  ;;  %s1381_s16 = int_to_ptr.vmem [resolvable:$true] %s1380_s16 }
 0x3e2   : > { %v1628_v51 = vpop.f32.mrf.mxu0  ;;  %s1801_s24 = scalar_lea.vmem %s1381_s16, 128  ;;  %p1808_p0 = scmp.lt.s32.totalorder %s1381_s16, %s1806_s17 }
 0x3e3   : > { %v1534_v51 = vld [vmem:[%s2249_s11] ss:$0 sm:$0xff]  ;;  %p1802_p10 = scmp.ne.s32.totalorder %s1381_s16, %s1801_s24  ;;  %p1809_p1 = scmp.lt.s32.totalorder %s1807_s28, %s1801_s24 }
 0x3e5   : > { %p1803_p11 = pnand %p1802_p10, %p2013_p4  ;;  %p1810_p2 = por %p1809_p1, %p1808_p0 }
 0x3e7   : > { %p1804_p13 = pneg %p1803_p11 }
 0x3e9   : > { %p1811_p3 = pnand %p1810_p2, %p1804_p13 }
 0x42a   : > { %v819_v52 = vpop.permute.xlu0 %818 }
 0x42b   : > { %822 = vst.msk [vmem:[#allocation3] sm:$0xf] %vm821_vm6, %v819_v52 }
 0x447   : > { %v942_v53 = vpop.permute.xlu1 %941 }
 0x448   : > { %945 = vst.msk [vmem:[#allocation3] sm:$0xf] %vm944_vm7, %v942_v53  ;;  %v1535_v53 = vld [vmem:[%s2250_s12] ss:$0 sm:$0xff] }
 0x453   : > { %v1065_v54 = vpop.permute.xlu1 %1064 }
 0x454   : > { %1068 = vst.msk [vmem:[#allocation3] sm:$0xf] %vm1067_vm8, %v1065_v54 }
 0x45b   : > { %v1069_v55 = vld [vmem:[#allocation3] sm:$0xf] }
 0x45c   : > { %1634 = vmatmul.mubr.msk.bf16.vlgmr.msra.gmra.mxu1 %vm536_vm0, %v1069_v55 }
 0x45d   : > { %1653 = vmatprep.mubr.msk.bf16.mxu1 %vm1887_vm1, %v1886_v0 }
 0x51c   : > { %v1130_v57 = vpop.f32.mrf.mxu1 }
 0x51d   : > { %v1131_v58 = vadd.f32 %v1518_v56, %v1130_v57 }
 0x51e   : > { %v1635_v59 = vpop.f32.mrf.mxu1 }
 0x51f   : > { %v1136_v60 = vadd.f32 %v1131_v58, %v2068_v3  ;;  %v1751_v3 = vld [vmem:[%s2245_s7 + $0x18] sm:$0xff]  }
 0x520   : > { %v1133_v61 = vpop.f32.mrf.mxu1  ;;  %1646 = vmatpush3.bf16.msra.mxu1 %v1751_v3 }
 0x521   : > { %v1137_v62 = vsel %vm536_vm0, %v1136_v60, 0.0  ;;  %1647 = vmatprep.subr.bf16.mxu1 %v1886_v0 }
 0x522   : > { %1138 = vadd.xlane.f32.xlu0 %v1137_v62  ;;  %v1636_v63 = vpop.f32.mrf.mxu1 }
 0x524   : > { %1648 = vmatpush3.bf16.msra.mxu1 %v1752_v9 }
 0x525   : > { %1649 = vmatprep.subr.bf16.mxu1 %v1886_v0 }
 0x528   : > { %1650 = vmatpush3.bf16.msra.mxu1 %v1753_v21 }
 0x529   : > { %1651 = vmatprep.subr.bf16.mxu1 %v1886_v0 }
 0x52c   : > { %1652 = vmatpush3.bf16.msra.mxu1 %v1754_v22 }
 0x5ab   : > { %v1139_v1 = vpop.xlane.xlu0 %1138 }
 0x5ac   : > { %v1141_v2 = vmul.f32 0.03125, %v1139_v1 }
 0x5ae   : > { %v1142_v4 = vsub.f32 %v1136_v60, %v1141_v2 }
 0x5b0   : > { %v1143_v5 = vmul.f32 %v1142_v4, %v1142_v4 }
 0x5b2   : > { %v1144_v6 = vsel %vm536_vm0, %v1143_v5, 0.0 }
 0x5b3   : > { %1145 = vadd.xlane.f32.xlu1 %v1144_v6 }
 0x63c   : > { %v1146_v10 = vpop.xlane.xlu1 %1145 }
 0x63d   : > { %v1147_v11 = vmul.f32 0.03125, %v1146_v10 }
 0x63f   : > { %v1148_v12 = vadd.f32 1e-05, %v1147_v11 }
 0x641   : > { %1771 = vrsqrt.f32 %v1148_v12 }
 0x64e   : > { %v1772_v13 = vpop.eup %1771 }
 0x64f   : > { %v1150_v15 = vmul.f32 %v1772_v13, %v1142_v4 }
 0x651   : > { %v1158_v17 = vmul.f32 %v1522_v14, %v1150_v15 }
 0x653   : > { %v1166_v18 = vadd.f32 %v1523_v16, %v1158_v17 }
 0x655   : > { %1167 = vst.msk [vmem:[#allocation4] sm:$0xff] %vm536_vm0, %v1166_v18  ;;  %v1168_v19 = vpack.c.bf16 %v1166_v18, %v1166_v18 }
 0x657   : > { %1170 = vst.msk [vmem:[#allocation5] sm:$0xf] %vm1169_vm9, %v1168_v19 }
 0x65c   : > { %v1324_v36 = vld [vmem:[#allocation4] sm:$0xff] }
 0x65e   : > { %v1172_v20 = vld [vmem:[#allocation5] sm:$0xf] }
 0x65f   : > { %1642 = vmatmul.mubr.msk.bf16.vlgmr.msra.gmra.mxu0 %vm536_vm0, %v1172_v20 }
 0x71f   : > { %v1234_v24 = vpop.f32.mrf.mxu0 }
 0x720   : > { %v1235_v25 = vadd.f32 %v1524_v23, %v1234_v24 }
 0x721   : > { %v1643_v26 = vpop.f32.mrf.mxu0 }
 0x722   : > { %v1240_v27 = vmax.f32 %v1235_v25, 0.0 }
 0x723   : > { %v1237_v28 = vpop.f32.mrf.mxu0 }
 0x724   : > { %v1241_v29 = vpack.c.bf16 %v1240_v27, %v1240_v27 }
 0x725   : > { %v1644_v30 = vpop.f32.mrf.mxu0 }
 0x726   : > { %1654 = vmatmul.mubr.msk.bf16.vlgmr.msra.gmra.mxu1 %vm1275_vm10, %v1241_v29 }
 0x7e6   : > { %v1313_v0 = vpop.f32.mrf.mxu1 }
 0x7e7   : > { %v1319_v32 = vadd.f32 %v1313_v0, %v1242_v31 }
 0x7e8   : > { %v1655_v33 = vpop.f32.mrf.mxu1 }
 0x7e9   : > { %1320 = vst.msk [vmem:[#allocation6] sm:$0xff] %vm536_vm0, %v1319_v32 }
 0x7ea   : > { %v1316_v34 = vpop.f32.mrf.mxu1 }
 0x7ec   : > { %v1656_v35 = vpop.f32.mrf.mxu1 }
 0x7f0   : > { %v1325_v37 = vld [vmem:[#allocation6] sm:$0xff] }
 0x7f1   : > { %v1326_v39 = vadd.f32 %v1325_v37, %v1324_v36 }
 0x7f3   : > { %v1334_v40 = vadd.f32 %v1533_v38, %v1326_v39 }
 0x7f5   : > { %v1335_v41 = vsel %vm536_vm0, %v1334_v40, 0.0 }
 0x7f6   : > { %1336 = vadd.xlane.f32.xlu0 %v1335_v41 }
 0x87f   : > { %v1337_v42 = vpop.xlane.xlu0 %1336 }
 0x880   : > { %v1339_v43 = vmul.f32 0.03125, %v1337_v42 }
 0x882   : > { %v1340_v44 = vsub.f32 %v1334_v40, %v1339_v43 }
 0x884   : > { %v1341_v45 = vmul.f32 %v1340_v44, %v1340_v44 }
 0x886   : > { %v1342_v46 = vsel %vm536_vm0, %v1341_v45, 0.0 }
 0x887   : > { %1343 = vadd.xlane.f32.xlu0 %v1342_v46 }
 0x910   : > { %v1344_v47 = vpop.xlane.xlu0 %1343 }
 0x911   : > { %v1345_v48 = vmul.f32 0.03125, %v1344_v47 }
 0x913   : > { %v1346_v49 = vadd.f32 1e-05, %v1345_v48 }
 0x915   : > { %1773 = vrsqrt.f32 %v1346_v49 }
 0x922   : > { %v1774_v50 = vpop.eup %1773 }
 0x923   : > { %v1348_v52 = vmul.f32 %v1774_v50, %v1340_v44 }
 0x925   : > { %v1356_v54 = vmul.f32 %v1534_v51, %v1348_v52 }
 0x927   : > { %v1364_v55 = vadd.f32 %v1535_v53, %v1356_v54 }
 0x929   : > { %1365 = vst.msk [vmem:[%s492_s29] sm:$0xff] %vm536_vm0, %v1364_v55 }
 0x92a   : > { %1814 = shalt.err (!%p1811_p3)
}
 0x92b   : > { %s1815_s0 = scalar_lea.hbm %s1378_s2, 128  ;;  %s1819_s23 = scalar_lea.hbm %s2251_s13, 256 }
 0x92c   : > { %p1816_p5 = scmp.ne.s32.totalorder %s1378_s2, %s1815_s0  ;;  %p1820_p9 = scmp.lt.s32.totalorder %s1378_s2, %s2251_s13 }
 0x92d   : > { %p1821_p12 = scmp.lt.s32.totalorder %s1819_s23, %s1815_s0 }
 0x92e   : > { %p1817_p6 = pnand %p1816_p5, %p2013_p4 }
 0x92f   : > { %p1822_p10 = por %p1821_p12, %p1820_p9 }
 0x930   : > { %p1818_p7 = pneg %p1817_p6 }
 0x932   : > { %p1823_p11 = pnand %p1822_p10, %p1818_p7 }
 0x934   : > { %1826 = shalt.err (!%p1823_p11)
}
 0x935   : > { %1661 = dma.vmem_to_hbm [thread:$0]  (%p2013_p4), %s1381_s16, 128, %s1378_s2, %s1367_s3  }
 0x936 PF: > { %p1673_p13 = scmp.ge.s32.totalorder %s1881_s30, 2  ;;  %s1392_s29 = sand.u32 1, %s1861_s25  }
 0x937   : > { %s1393_s24 = scalar_lea.sflag [#allocation9], %s1392_s29 }
 0x938   : > { %p1668_p0 = pnand %p1673_p13, %p2020_p8 }
 0x93a   : > { %p1669_p1 = pneg %p1668_p0 }
 0x93c   : > { %1856 = dma.done.wait (%p1669_p1), %s1393_s24, 128  }
 0x93d   : > { %1858 = vsyncadd (%p1669_p1), %s1393_s24, 4294967168  ;;  %s27_s30 = sadd.s32 1, %s1881_s30   ;;  %s2268_s28 = sld [smem:[#allocation13_spill]] }
 0x93e   : > { %p24_p2 = scmp.ge.s32.totalorder %s27_s30, 4   ;;  %s2269_s29 = sld [smem:[#allocation14_spill]] }
 0x93f   : > { %s2270_s25 = smov %s1865_s26  ;;  %s2271_s26 = smov %s1869_s27 }
 0x940   : > { %s2272_s27 = smov %s2026_s21  ;;  %26 = sbr.rel (!%p24_p2) target bundleno = 10 (0xa), region = 127 }
 0x945   :  { %1398 = vsyncpa [#allocation8], 1 }
 0x946   :  { %1400 = vsyncpa [#allocation8 + $0x1], 1 }
 0x947   :  { %1401 = vsyncpa [#allocation9], 1 }
 0x948   :  { %1403 = vsyncpa [#allocation9 + $0x1], 1 }

</bundles_post_ra>
